<compile_context>
chip_gen: v5e
topology: v5e:2x2
jax: 0.10.0
libtpu: 0.0.40
codegen_flags: <defaults>
</compile_context>

<pallas_src>
import functools

import jax
import jax.numpy as jnp
from jax import lax
from jax.experimental import pallas as pl
from jax.experimental.pallas import tpu as pltpu

LANE = 128      # lane width
SUBLANE = 8     # sublane tile height
MAX_TM = 4096   # rows per block: 4096*128*4B = 2 MiB per f32 input block
INNER = 64      # rows per inner-loop chunk (64*128*4B = 32 KiB -> ~8 vregs)


@functools.lru_cache(maxsize=1)
def _num_tensorcores() -> int:
    """Best-effort TensorCores-per-chip (2 on v7x, 1 on v5e/v6e)."""
    try:
        info = pltpu.get_tpu_info()
    except Exception:
        return 1
    for name in ("num_cores", "core_count", "num_tensorcores",
                 "tensorcores_per_chip", "cores_per_chip"):
        v = getattr(info, name, None)
        if isinstance(v, int) and v >= 1:
            return max(1, min(int(v), 2))
    return 1


def _sq_err_sum(o, t):
    """Pure-JAX sum((sigmoid(o) - t)^2) for tiny tails / tiny inputs."""
    d = jax.nn.sigmoid(o.astype(jnp.float32)) - t.astype(jnp.float32)
    return jnp.sum(d * d, dtype=jnp.float32)


def _rmse_kernel(o_ref, t_ref, acc_ref, *, tm, inner, rows, bpc, split,
                 emit_mask):
    """Accumulate per-lane sums of squared error into the (8,128) output block."""
    if split:
        c = pl.program_id(0)            # core axis (CORE_PARALLEL)
        i = pl.program_id(1)            # reduction axis ("arbitrary")
        block = c * bpc + i             # logical block id (may overshoot)
    else:
        i = pl.program_id(0)
        block = i

    @pl.when(i == 0)
    def _init():
        acc_ref[...] = jnp.zeros_like(acc_ref)

    n_inner = tm // inner               # static

    def partial_sum(masked):
        def body(j, acc):
            r0 = pl.multiple_of(j * inner, inner)
            o = o_ref[pl.ds(r0, inner), :].astype(jnp.float32)
            t = t_ref[pl.ds(r0, inner), :].astype(jnp.float32)
            # sigmoid(o) - t with a single transcendental:
            #   sigmoid(x) = 0.5 * tanh(0.5 * x) + 0.5
            d = 0.5 * jnp.tanh(0.5 * o) + (0.5 - t)
            if masked:
                row = (block * tm + r0 +
                       lax.broadcasted_iota(jnp.int32, (inner, LANE), 0))
                d = jnp.where(row < rows, d, 0.0)
            sq = d * d
            # Fold groups of 8 rows with plain vreg adds (no cross-lane work).
            return acc + sq.reshape(inner // SUBLANE, SUBLANE, LANE).sum(axis=0)

        return lax.fori_loop(0, n_inner, body,
                             jnp.zeros((SUBLANE, LANE), jnp.float32))

    if emit_mask:
        # Only blocks that actually overhang the array (or are clamped
        # duplicates on the last core) pay the iota/compare/select path.
        clean = (block * tm + tm) <= rows

        @pl.when(clean)
        def _plain():
            acc_ref[...] += partial_sum(False)

        @pl.when(jnp.logical_not(clean))
        def _masked():
            acc_ref[...] += partial_sum(True)
    else:
        acc_ref[...] += partial_sum(False)


def rmse_loss(out, target, eps=1e-6):
    assert out.shape == target.shape
    total = out.size

    flat_o = out.reshape(-1)            # free (contiguous) reshape
    flat_t = target.reshape(-1)

    itemsize = min(out.dtype.itemsize, target.dtype.itemsize)
    align = max(SUBLANE, 32 // itemsize)   # 8 (f32), 16 (bf16), 32 (int8/fp8)

    rows = total // LANE                # rows of the lane-dense 2-D view
    rem = total % LANE                  # < 128 leftover elements

    if rows < align:
        # Too small to tile — pure JAX (exactly the reference formula).
        sse = _sq_err_sum(flat_o, flat_t)
        return jnp.sqrt(sse / jnp.float32(total) + jnp.float32(eps))

    tail_sse = jnp.float32(0.0)
    if rem:
        # <128 leftover elements: tiny pure-JAX squared-error sum (no jnp.pad,
        # no full-array padded copy of either input).
        aligned = total - rem
        tail_sse = _sq_err_sum(flat_o[aligned:], flat_t[aligned:])
        flat_o = flat_o[:aligned]
        flat_t = flat_t[:aligned]

    o2 = flat_o.reshape(rows, LANE)
    t2 = flat_t.reshape(rows, LANE)

    # Block rows: multiple of the dtype sublane alignment, never larger than
    # the array, so only the classic "last block overhangs" case can occur.
    tm = min(MAX_TM, (rows // align) * align)
    inner = next(s for s in (INNER, 32, 16, 8) if tm % s == 0)
    n_blocks = pl.cdiv(rows, tm)

    ncores = _num_tensorcores()
    split = (ncores >= 2) and (n_blocks >= 2)

    if split:
        bpc = pl.cdiv(n_blocks, ncores)
        grid = (ncores, bpc)
        emit_mask = (ncores * bpc * tm) != rows

        def in_map(c, i):
            # Clamp so duplicated trailing blocks stay in-bounds; their
            # contribution is zeroed by the masked path in-kernel.
            return (jnp.minimum(c * bpc + i, n_blocks - 1), 0)

        out_shape = jax.ShapeDtypeStruct((ncores, SUBLANE, LANE), jnp.float32)
        out_spec = pl.BlockSpec((None, SUBLANE, LANE), lambda c, i: (c, 0, 0))
        core_par = getattr(pltpu, "CORE_PARALLEL", None)
        sems = ((core_par, pltpu.ARBITRARY) if core_par is not None
                else ("parallel", "arbitrary"))
    else:
        bpc = n_blocks
        grid = (n_blocks,)
        emit_mask = (n_blocks * tm) != rows

        def in_map(i):
            return (i, 0)

        out_shape = jax.ShapeDtypeStruct((SUBLANE, LANE), jnp.float32)
        out_spec = pl.BlockSpec((SUBLANE, LANE), lambda i: (0, 0))
        sems = ("arbitrary",)

    kernel = functools.partial(
        _rmse_kernel, tm=tm, inner=inner, rows=rows, bpc=bpc, split=split,
        emit_mask=emit_mask)

    partials = pl.pallas_call(
        kernel,
        out_shape=out_shape,
        grid_spec=pltpu.PrefetchScalarGridSpec(
            num_scalar_prefetch=0,
            grid=grid,
            in_specs=[pl.BlockSpec((tm, LANE), in_map),
                      pl.BlockSpec((tm, LANE), in_map)],
            out_specs=out_spec,
        ),
        compiler_params=pltpu.CompilerParams(
            dimension_semantics=sems,
            vmem_limit_bytes=32 * 1024 * 1024),
    )(o2, t2)

    # Tiny epilogue: one cross-lane reduce + tail + mean + sqrt.
    sse = jnp.sum(partials) + tail_sse
    return jnp.sqrt(sse / jnp.float32(total) + jnp.float32(eps))


def rmse_loss_ref(out, target, eps=1e-6):
    """Pure-JAX reference matching the PyTorch module."""
    o = jax.nn.sigmoid(out.astype(jnp.float32))
    t = target.astype(jnp.float32)
    return jnp.sqrt(jnp.mean((o - t) ** 2) + eps)


if __name__ == "__main__":
    key = jax.random.PRNGKey(0)

    cases = [
        (2, 4, 16, 16),      # primary: batch=2, channels=4, 16x16 masks
        (3, 5, 33, 47),      # ragged: masked last block + <128-elem JAX tail
        (4, 16, 128, 128),   # multi-block reduction grid (rows > MAX_TM)
        (2, 3, 11, 13),      # tiny: pure-JAX fallback path
    ]
    for idx, shape in enumerate(cases):
        kx, kt = jax.random.split(jax.random.fold_in(key, idx))
        x = jax.random.normal(kx, shape, dtype=jnp.float32)      # logits
        t = jax.random.uniform(kt, shape, dtype=jnp.float32)     # targets in [0,1)
        loss = jax.block_until_ready(rmse_loss(x, t))
        ref = jax.block_until_ready(rmse_loss_ref(x, t))
        assert jnp.allclose(loss, ref, rtol=1e-4, atol=1e-6), (shape, loss, ref)

    print("KERNEL_OK")
</pallas_src>

<mosaic_0001>
module attributes {stable_mosaic.version = 11 : i64} {
  func.func @_rmse_kernel(%arg0: i32, %arg1: memref<16x128xf32, #tpu.memory_space<vmem>>, %arg2: memref<16x128xf32, #tpu.memory_space<vmem>>, %arg3: memref<8x128xf32, #tpu.memory_space<vmem>>) attributes {dimension_semantics = [#tpu.dimension_semantics<arbitrary>], iteration_bounds = array<i64: 1>, scalar_prefetch = 0 : i64, scratch_operands = 0 : i64, tpu.core_type = #tpu.core_type<tc>, window_params = [{transform_indices = @transform_0, window_bounds = array<i64: 16, 128>}, {transform_indices = @transform_1, window_bounds = array<i64: 16, 128>}, {pipeline_mode = #tpu.pipeline_mode<synchronous>, transform_indices = @transform_2, window_bounds = array<i64: 8, 128>}]} {
    %c0_i32 = arith.constant 0 : i32
    %0 = arith.cmpi eq, %arg0, %c0_i32 : i32
    %1 = arith.extui %0 : i1 to i32
    %c0_i32_0 = arith.constant 0 : i32
    %2 = arith.cmpi ne, %1, %c0_i32_0 : i32
    scf.if %2 {
      %cst_11 = arith.constant 0.000000e+00 : f32
      %25 = vector.broadcast %cst_11 : f32 to vector<8x128xf32>
      %c0_12 = arith.constant 0 : index
      %c0_13 = arith.constant 0 : index
      %26 = vector.load %arg3[%c0_12, %c0_13] : memref<8x128xf32, #tpu.memory_space<vmem>>, vector<8x128xf32>
      tpu.vector_store %arg3[%c0_12, %c0_13], %25 {strides = array<i32>} : memref<8x128xf32, #tpu.memory_space<vmem>>, vector<8x128xf32>,
    } else {
    }
    %c0 = arith.constant 0 : index
    %c0_1 = arith.constant 0 : index
    %3 = vector.load %arg3[%c0, %c0_1] : memref<8x128xf32, #tpu.memory_space<vmem>>, vector<8x128xf32>
    %cst = arith.constant 0.000000e+00 : f32
    %4 = vector.broadcast %cst : f32 to vector<8x128xf32>
    %c0_i32_2 = arith.constant 0 : i32
    %c16_i32 = arith.constant 16 : i32
    %5 = arith.muli %c0_i32_2, %c16_i32 : i32
    %6 = tpu.assume_multiple %5, 16 : i32
    %7 = arith.index_cast %6 : i32 to index
    %c0_3 = arith.constant 0 : index
    %8 = vector.load %arg1[%7, %c0_3] : memref<16x128xf32, #tpu.memory_space<vmem>>, vector<16x128xf32>
    %9 = arith.index_cast %6 : i32 to index
    %c0_4 = arith.constant 0 : index
    %10 = vector.load %arg2[%9, %c0_4] : memref<16x128xf32, #tpu.memory_space<vmem>>, vector<16x128xf32>
    %cst_5 = arith.constant 5.000000e-01 : f32
    %11 = vector.broadcast %cst_5 : f32 to vector<16x128xf32>
    %12 = arith.mulf %11, %8 : vector<16x128xf32>
    %13 = math.tanh %12 : vector<16x128xf32>
    %cst_6 = arith.constant 5.000000e-01 : f32
    %14 = vector.broadcast %cst_6 : f32 to vector<16x128xf32>
    %15 = arith.mulf %14, %13 : vector<16x128xf32>
    %cst_7 = arith.constant 5.000000e-01 : f32
    %16 = vector.broadcast %cst_7 : f32 to vector<16x128xf32>
    %17 = arith.subf %16, %10 : vector<16x128xf32>
    %18 = arith.addf %15, %17 : vector<16x128xf32>
    %19 = arith.mulf %18, %18 : vector<16x128xf32>
    %20 = vector.shape_cast %19 : vector<16x128xf32> to vector<2x8x128xf32>
    %cst_8 = arith.constant dense<0.000000e+00> : vector<8x128xf32>
    %21 = vector.multi_reduction <add>, %20, %cst_8 [0] : vector<2x8x128xf32> to vector<8x128xf32>
    %22 = arith.addf %4, %21 : vector<8x128xf32>
    %c1_i32 = arith.constant 1 : i32
    %23 = arith.addf %3, %22 : vector<8x128xf32>
    %c0_9 = arith.constant 0 : index
    %c0_10 = arith.constant 0 : index
    %24 = vector.load %arg3[%c0_9, %c0_10] : memref<8x128xf32, #tpu.memory_space<vmem>>, vector<8x128xf32>
    tpu.vector_store %arg3[%c0_9, %c0_10], %23 {strides = array<i32>} : memref<8x128xf32, #tpu.memory_space<vmem>>, vector<8x128xf32>,
    return
  }
  func.func @transform_0(%arg0: i32) -> (i32, i32) {
    %c0_i32 = arith.constant 0 : i32
    %c0_i32_0 = arith.constant 0 : i32
    return %arg0, %c0_i32 : i32, i32
  }
  func.func @transform_1(%arg0: i32) -> (i32, i32) {
    %c0_i32 = arith.constant 0 : i32
    %c0_i32_0 = arith.constant 0 : i32
    return %arg0, %c0_i32 : i32, i32
  }
  func.func @transform_2(%arg0: i32) -> (i32, i32) {
    %c0_i32 = arith.constant 0 : i32
    %c0_i32_0 = arith.constant 0 : i32
    %c0_i32_1 = arith.constant 0 : i32
    return %c0_i32, %c0_i32_0 : i32, i32
  }
}

</mosaic_0001>

<bundles_post_ra>
// kernel: tpu_custom_call.1
= control target key start
LH: loop header
LB: loop body
LE: loop exit
PB: predicated region body
PF: predicated region fallthrough
CT: control target
= control target key end

     0   :  { %7 = vsyncpa [#allocation3], 0  ;;  %s205_s0 = inlined_call_operand.hbm [shape: f32[16,128], index: 0, kind: input, shape index: {}]   ;;  %s206_s1 = inlined_call_operand.hbm [shape: f32[16,128], index: 1, kind: input, shape index: {}]   ;;  %s207_s2 = inlined_call_operand.hbm [shape: f32[8,128], index: 2, kind: output, shape index: {}]  }
   0x1   :  { %8 = vsyncpa [#allocation6], 0 }
   0x2   :  { %9 = vsyncpa [#allocation4], 0  ;;  %s14_s11 = sshll.u32 %s205_s0, 4  ;;  %s176_s12 = smov [#allocation2]   ;;  %s15_s11 = int_to_ptr.hbm [resolvable:$true] %s14_s11 }
   0x3   :  { %s16_s13 = sshll.u32 %s176_s12, 4  ;;  %s27_s16 = sshll.u32 %s206_s1, 4  ;;  %s17_s13 = int_to_ptr.vmem [resolvable:$true] %s16_s13  ;;  %s28_s16 = int_to_ptr.hbm [resolvable:$true] %s27_s16 }
   0x4   :  { %s177_s17 = smov 128   ;;  %s178_s18 = smov 8  }
   0x5   :  { %22 = dma.hbm_to_vmem [thread:$0]  %s15_s11, 256, %s17_s13, [#allocation3], %s177_s17, %s177_s17, %s178_s18  }
   0x6   :  { %s179_s19 = smov [#allocation5]  }
   0x7   :  { %s29_s20 = sshll.u32 %s179_s19, 4  ;;  %s30_s20 = int_to_ptr.vmem [resolvable:$true] %s29_s20 }
   0x8   :  { %35 = dma.hbm_to_vmem [thread:$0]  %s28_s16, 256, %s30_s20, [#allocation6], %s177_s17, %s177_s17, %s178_s18  }
   0x9   :  { %170 = dma.done.wait [#allocation3], 256  }
   0xa   :  { %171 = vsyncadd [#allocation3], 4294967040 }
   0xb   :  { %172 = dma.done.wait [#allocation6], 256  }
   0xc   :  { %173 = vsyncadd [#allocation6], 4294967040  ;;  %v50_v0 = vld [vmem:[#allocation2] sm:$0xff]  ;;  %v51_v1 = vld [vmem:[#allocation2 + $0x8] sm:$0xff]  ;;  %s180_s0 = smov [#allocation7]   ;;  %s77_s23 = sshll.u32 %s207_s2, 4  ;;  %s78_s23 = int_to_ptr.hbm [resolvable:$true] %s77_s23 }
   0xd   :  { %v54_v2 = vmul.f32 0.5, %v50_v0  ;;  %v55_v3 = vmul.f32 0.5, %v51_v1  ;;  %v52_v4 = vld [vmem:[#allocation5] sm:$0xff]  ;;  %v53_v5 = vld [vmem:[#allocation5 + $0x8] sm:$0xff]  ;;  %s75_s1 = sshll.u32 %s180_s0, 4  ;;  %s76_s1 = int_to_ptr.vmem [resolvable:$true] %s75_s1 }
   0xe   :  { %v60_v6 = vsub.f32 0.5, %v52_v4  ;;  %v61_v8 = vsub.f32 0.5, %v53_v5 }
   0xf   :  { %94 = vtanh.f32 %v54_v2 }
  0x10   :  { %96 = vtanh.f32 %v55_v3 }
  0x15   :  { %v95_v7 = vpop.eup %94 }
  0x16   :  { %v97_v9 = vpop.eup %96  ;;  %v58_v10 = vmul.f32 0.5, %v95_v7 }
  0x17   :  { %v59_v11 = vmul.f32 0.5, %v97_v9 }
  0x18   :  { %v62_v12 = vadd.f32 %v60_v6, %v58_v10 }
  0x19   :  { %v63_v13 = vadd.f32 %v61_v8, %v59_v11 }
  0x1a   :  { %v64_v14 = vmul.f32 %v62_v12, %v62_v12 }
  0x1b   :  { %v65_v15 = vmul.f32 %v63_v13, %v63_v13 }
  0x1d   :  { %v66_v16 = vadd.f32 %v65_v15, %v64_v14 }
  0x1f   :  { %69 = vst [vmem:[#allocation7] sm:$0xff] %v66_v16 }
  0x20   :  { %80 = dma.vmem_to_hbm [thread:$0]  %s76_s1, 128, %s78_s23, [#allocation4]  }
  0x21   :  { %174 = dma.done.wait [#allocation4], 128  }
  0x22   :  { %175 = vsyncadd [#allocation4], 4294967168 }
  0x23   :  { %85 = vsyncpa [#allocation3], 1 }
  0x24   :  { %86 = vsyncpa [#allocation6], 1 }
  0x25   :  { %87 = vsyncpa [#allocation4], 1 }

</bundles_post_ra>
